<compile_context>
chip_gen: v7x
topology: tpu7x:2x2x1
jax: 0.10.0
libtpu: 0.0.40
codegen_flags: <defaults>
</compile_context>

<pallas_src>
import jax
import jax.numpy as jnp
from jax.experimental import pallas as pl
from jax.experimental.pallas import tpu as pltpu


NEG_SLOPE = 0.01        # PyTorch nn.LeakyReLU default negative_slope
LANE = 128              # TPU lane width
H1 = 3                  # hidden features of Linear(1, 3)
H2 = 7                  # output features of Linear(3, 7)
MAX_TILE_ROWS = 2048    # rows-of-128-lanes per grid step (1 MiB in, 7 MiB out)
VMEM_LIMIT_BYTES = 32 * 1024 * 1024  # fits 2x(1+7) MiB double-buffer + temps


def _leaky_relu(x):
    # max(x, a*x) == leaky_relu(x) for a < 1; 2 VALU ops vs 3 for where().
    return jnp.maximum(x, NEG_SLOPE * x)


def generator_kernel(w1_ref, b1_ref, w2_ref, b2_ref, x_ref, o_ref):
    # w1_ref: (3,)  SMEM   -- Linear(1,3) weight
    # b1_ref: (3,)  SMEM
    # w2_ref: (21,) SMEM   -- Linear(3,7) weight, row-major (k, j) -> k*7 + j
    # b2_ref: (7,)  SMEM
    # x_ref : (TILE_ROWS, 128) VMEM  -- batch mapped to sublane x lane
    # o_ref : (7, TILE_ROWS, 128) VMEM -- one lane-dense plane per output feat
    x = x_ref[...]

    # Layer 1: Linear(1, 3) + LeakyReLU  -> 3 lane-dense hidden planes.
    # (Kept as whole-tile temporaries: VALU, not ld/st, is the binding slot.)
    h = [_leaky_relu(x * w1_ref[k] + b1_ref[k]) for k in range(H1)]

    # Layer 2: Linear(3, 7) + LeakyReLU  -> 7 lane-dense output planes.
    for j in range(H2):
        acc = h[0] * w2_ref[0 * H2 + j] + b2_ref[j]
        acc = acc + h[1] * w2_ref[1 * H2 + j]
        acc = acc + h[2] * w2_ref[2 * H2 + j]
        o_ref[j] = _leaky_relu(acc).astype(o_ref.dtype)


def _tile_rows_for(rows_needed):
    """Pick tile so v7x gets >=2 grid steps whenever there is >1 vreg row."""
    if rows_needed <= 8:
        return 8
    half = -(-rows_needed // 2)          # ceil(rows/2)
    half = ((half + 7) // 8) * 8         # round up to sublane multiple
    return min(MAX_TILE_ROWS, half)


def generator_forward(x, w1, b1, w2, b2, *, feature_major=False,
                      out_dtype=jnp.float32):
    """Forward pass of the Generator.

    x: (B, 1) f32; w1: (1,3); b1: (3,); w2: (3,7); b2: (7,)

    feature_major=False -> (B, H2), exact nn.Module semantics (pays for one
                           extra HBM pass to transpose the lane-dense slab).
    feature_major=True  -> (H2, B), zero-transpose fast path for fused
                           consumers (the review's recommended layout).
    """
    B = x.shape[0]

    rows_needed = max(1, -(-B // LANE))
    tile_rows = _tile_rows_for(rows_needed)
    rows_total = -(-rows_needed // tile_rows) * tile_rows
    n_pad = rows_total * LANE - B

    x_lanes = jnp.pad(x.reshape(-1).astype(jnp.float32),
                      (0, n_pad)).reshape(rows_total, LANE)

    w1f = w1.reshape(H1).astype(jnp.float32)
    b1f = b1.reshape(H1).astype(jnp.float32)
    w2f = w2.reshape(H1 * H2).astype(jnp.float32)
    b2f = b2.reshape(H2).astype(jnp.float32)

    smem_spec = pl.BlockSpec(memory_space=pltpu.MemorySpace.SMEM)

    out = pl.pallas_call(
        generator_kernel,
        out_shape=jax.ShapeDtypeStruct((H2, rows_total, LANE), out_dtype),
        grid=(rows_total // tile_rows,),
        in_specs=[
            smem_spec,  # w1
            smem_spec,  # b1
            smem_spec,  # w2
            smem_spec,  # b2
            pl.BlockSpec((tile_rows, LANE), lambda i: (i, 0)),
        ],
        # If a trace shows exposed output writeback at step boundaries, deepen
        # the output pipeline with: pipeline_mode=pl.Buffered(3)  (fits VMEM).
        out_specs=pl.BlockSpec((H2, tile_rows, LANE), lambda i: (0, i, 0)),
        compiler_params=pltpu.CompilerParams(
            dimension_semantics=("parallel",),
            vmem_limit_bytes=VMEM_LIMIT_BYTES,
        ),
    )(w1f, b1f, w2f, b2f, x_lanes)

    if feature_major:
        # No transpose: (7, rows, 128) -> (7, rows*128) is a free reshape;
        # only the padded tail is trimmed.
        return out.reshape(H2, rows_total * LANE)[:, :B]

    # (B, 7) row-major as per the nn.Module API. This transpose re-moves the
    # whole output through HBM and dominates end-to-end cost at large B;
    # prefer feature_major=True / fusing the layout change into the consumer
    # (e.g. the Discriminator's first Linear) when possible.
    y = out.transpose(1, 2, 0).reshape(rows_total * LANE, H2)[:B]
    return y


def init_params(key):
    """Mimics PyTorch nn.Linear default init: U(-1/sqrt(fan_in), 1/sqrt(fan_in))."""
    k1, k2, k3, k4 = jax.random.split(key, 4)
    bound1 = 1.0 / jnp.sqrt(1.0)
    w1 = jax.random.uniform(k1, (1, H1), jnp.float32, -bound1, bound1)
    b1 = jax.random.uniform(k2, (H1,), jnp.float32, -bound1, bound1)
    bound2 = 1.0 / jnp.sqrt(3.0)
    w2 = jax.random.uniform(k3, (H1, H2), jnp.float32, -bound2, bound2)
    b2 = jax.random.uniform(k4, (H2,), jnp.float32, -bound2, bound2)
    return w1, b1, w2, b2


def reference_forward(x, w1, b1, w2, b2):
    def lrelu(v):
        return jnp.where(v > 0, v, NEG_SLOPE * v)
    h = lrelu(x @ w1 + b1)
    return lrelu(h @ w2 + b2)


if __name__ == "__main__":
    key = jax.random.PRNGKey(0)
    pkey, xkey, xkey2 = jax.random.split(key, 3)
    w1, b1, w2, b2 = init_params(pkey)

    # Generator is fed one scalar noise per sample: (batch, 1).
    # batch=200 exercises the pad-to-128-lanes path with a single grid step.
    batch = 200
    x = jax.random.uniform(xkey, (batch, 1), jnp.float32)

    out = generator_forward(x, w1, b1, w2, b2)
    out = jax.block_until_ready(out)
    ref = reference_forward(x, w1, b1, w2, b2)
    assert out.shape == (batch, H2)
    assert jnp.allclose(out, ref, atol=1e-5, rtol=1e-5), "mismatch vs reference"

    # Zero-transpose feature-major fast path.
    out_fm = generator_forward(x, w1, b1, w2, b2, feature_major=True)
    out_fm = jax.block_until_ready(out_fm)
    assert out_fm.shape == (H2, batch)
    assert jnp.allclose(out_fm, ref.T, atol=1e-5, rtol=1e-5), "feature-major mismatch"

    # Larger batch exercises the multi-step grid (>=2 parallel steps for v7x).
    batch2 = 2500
    x2 = jax.random.uniform(xkey2, (batch2, 1), jnp.float32)
    out2 = generator_forward(x2, w1, b1, w2, b2)
    out2 = jax.block_until_ready(out2)
    ref2 = reference_forward(x2, w1, b1, w2, b2)
    assert out2.shape == (batch2, H2)
    assert jnp.allclose(out2, ref2, atol=1e-5, rtol=1e-5), "multi-tile mismatch"

    print("KERNEL_OK")
</pallas_src>

<mosaic_0001>
module attributes {stable_mosaic.version = 11 : i64} {
  func.func @generator_kernel(%arg0: i32, %arg1: memref<3xf32, #tpu.memory_space<smem>>, %arg2: memref<3xf32, #tpu.memory_space<smem>>, %arg3: memref<21xf32, #tpu.memory_space<smem>>, %arg4: memref<7xf32, #tpu.memory_space<smem>>, %arg5: memref<8x128xf32, #tpu.memory_space<vmem>>, %arg6: memref<7x8x128xf32, #tpu.memory_space<vmem>>) attributes {dimension_semantics = [#tpu.dimension_semantics<parallel>], iteration_bounds = array<i64: 1>, scalar_prefetch = 0 : i64, scratch_operands = 0 : i64, tpu.core_type = #tpu.core_type<tc>, window_params = [{transform_indices = @transform_0, window_bounds = array<i64: 3>}, {transform_indices = @transform_1, window_bounds = array<i64: 3>}, {transform_indices = @transform_2, window_bounds = array<i64: 21>}, {transform_indices = @transform_3, window_bounds = array<i64: 7>}, {transform_indices = @transform_4, window_bounds = array<i64: 8, 128>}, {transform_indices = @transform_5, window_bounds = array<i64: 7, 8, 128>}]} {
    %c0 = arith.constant 0 : index
    %c0_0 = arith.constant 0 : index
    %0 = vector.load %arg5[%c0, %c0_0] : memref<8x128xf32, #tpu.memory_space<vmem>>, vector<8x128xf32>
    %c0_1 = arith.constant 0 : index
    %1 = memref.load %arg1[%c0_1] : memref<3xf32, #tpu.memory_space<smem>>
    %2 = vector.broadcast %1 : f32 to vector<8x128xf32>
    %3 = arith.mulf %0, %2 : vector<8x128xf32>
    %c0_2 = arith.constant 0 : index
    %4 = memref.load %arg2[%c0_2] : memref<3xf32, #tpu.memory_space<smem>>
    %5 = vector.broadcast %4 : f32 to vector<8x128xf32>
    %6 = arith.addf %3, %5 : vector<8x128xf32>
    %cst = arith.constant 0.00999999977 : f32
    %7 = vector.broadcast %cst : f32 to vector<8x128xf32>
    %8 = arith.mulf %7, %6 : vector<8x128xf32>
    %9 = arith.maximumf %6, %8 : vector<8x128xf32>
    %c1 = arith.constant 1 : index
    %10 = memref.load %arg1[%c1] : memref<3xf32, #tpu.memory_space<smem>>
    %11 = vector.broadcast %10 : f32 to vector<8x128xf32>
    %12 = arith.mulf %0, %11 : vector<8x128xf32>
    %c1_3 = arith.constant 1 : index
    %13 = memref.load %arg2[%c1_3] : memref<3xf32, #tpu.memory_space<smem>>
    %14 = vector.broadcast %13 : f32 to vector<8x128xf32>
    %15 = arith.addf %12, %14 : vector<8x128xf32>
    %cst_4 = arith.constant 0.00999999977 : f32
    %16 = vector.broadcast %cst_4 : f32 to vector<8x128xf32>
    %17 = arith.mulf %16, %15 : vector<8x128xf32>
    %18 = arith.maximumf %15, %17 : vector<8x128xf32>
    %c2 = arith.constant 2 : index
    %19 = memref.load %arg1[%c2] : memref<3xf32, #tpu.memory_space<smem>>
    %20 = vector.broadcast %19 : f32 to vector<8x128xf32>
    %21 = arith.mulf %0, %20 : vector<8x128xf32>
    %c2_5 = arith.constant 2 : index
    %22 = memref.load %arg2[%c2_5] : memref<3xf32, #tpu.memory_space<smem>>
    %23 = vector.broadcast %22 : f32 to vector<8x128xf32>
    %24 = arith.addf %21, %23 : vector<8x128xf32>
    %cst_6 = arith.constant 0.00999999977 : f32
    %25 = vector.broadcast %cst_6 : f32 to vector<8x128xf32>
    %26 = arith.mulf %25, %24 : vector<8x128xf32>
    %27 = arith.maximumf %24, %26 : vector<8x128xf32>
    %c0_7 = arith.constant 0 : index
    %28 = memref.load %arg3[%c0_7] : memref<21xf32, #tpu.memory_space<smem>>
    %29 = vector.broadcast %28 : f32 to vector<8x128xf32>
    %30 = arith.mulf %9, %29 : vector<8x128xf32>
    %c0_8 = arith.constant 0 : index
    %31 = memref.load %arg4[%c0_8] : memref<7xf32, #tpu.memory_space<smem>>
    %32 = vector.broadcast %31 : f32 to vector<8x128xf32>
    %33 = arith.addf %30, %32 : vector<8x128xf32>
    %c7 = arith.constant 7 : index
    %34 = memref.load %arg3[%c7] : memref<21xf32, #tpu.memory_space<smem>>
    %35 = vector.broadcast %34 : f32 to vector<8x128xf32>
    %36 = arith.mulf %18, %35 : vector<8x128xf32>
    %37 = arith.addf %33, %36 : vector<8x128xf32>
    %c14 = arith.constant 14 : index
    %38 = memref.load %arg3[%c14] : memref<21xf32, #tpu.memory_space<smem>>
    %39 = vector.broadcast %38 : f32 to vector<8x128xf32>
    %40 = arith.mulf %27, %39 : vector<8x128xf32>
    %41 = arith.addf %37, %40 : vector<8x128xf32>
    %cst_9 = arith.constant 0.00999999977 : f32
    %42 = vector.broadcast %cst_9 : f32 to vector<8x128xf32>
    %43 = arith.mulf %42, %41 : vector<8x128xf32>
    %44 = arith.maximumf %41, %43 : vector<8x128xf32>
    %c0_10 = arith.constant 0 : index
    %c0_11 = arith.constant 0 : index
    %c0_12 = arith.constant 0 : index
    %45 = vector.load %arg6[%c0_10, %c0_11, %c0_12] : memref<7x8x128xf32, #tpu.memory_space<vmem>>, vector<1x8x128xf32>
    %46 = vector.shape_cast %45 : vector<1x8x128xf32> to vector<8x128xf32>
    %47 = vector.shape_cast %44 : vector<8x128xf32> to vector<1x8x128xf32>
    tpu.vector_store %arg6[%c0_10, %c0_11, %c0_12], %47 {strides = array<i32>} : memref<7x8x128xf32, #tpu.memory_space<vmem>>, vector<1x8x128xf32>,
    %c1_13 = arith.constant 1 : index
    %48 = memref.load %arg3[%c1_13] : memref<21xf32, #tpu.memory_space<smem>>
    %49 = vector.broadcast %48 : f32 to vector<8x128xf32>
    %50 = arith.mulf %9, %49 : vector<8x128xf32>
    %c1_14 = arith.constant 1 : index
    %51 = memref.load %arg4[%c1_14] : memref<7xf32, #tpu.memory_space<smem>>
    %52 = vector.broadcast %51 : f32 to vector<8x128xf32>
    %53 = arith.addf %50, %52 : vector<8x128xf32>
    %c8 = arith.constant 8 : index
    %54 = memref.load %arg3[%c8] : memref<21xf32, #tpu.memory_space<smem>>
    %55 = vector.broadcast %54 : f32 to vector<8x128xf32>
    %56 = arith.mulf %18, %55 : vector<8x128xf32>
    %57 = arith.addf %53, %56 : vector<8x128xf32>
    %c15 = arith.constant 15 : index
    %58 = memref.load %arg3[%c15] : memref<21xf32, #tpu.memory_space<smem>>
    %59 = vector.broadcast %58 : f32 to vector<8x128xf32>
    %60 = arith.mulf %27, %59 : vector<8x128xf32>
    %61 = arith.addf %57, %60 : vector<8x128xf32>
    %cst_15 = arith.constant 0.00999999977 : f32
    %62 = vector.broadcast %cst_15 : f32 to vector<8x128xf32>
    %63 = arith.mulf %62, %61 : vector<8x128xf32>
    %64 = arith.maximumf %61, %63 : vector<8x128xf32>
    %c1_16 = arith.constant 1 : index
    %c0_17 = arith.constant 0 : index
    %c0_18 = arith.constant 0 : index
    %65 = vector.load %arg6[%c1_16, %c0_17, %c0_18] : memref<7x8x128xf32, #tpu.memory_space<vmem>>, vector<1x8x128xf32>
    %66 = vector.shape_cast %65 : vector<1x8x128xf32> to vector<8x128xf32>
    %67 = vector.shape_cast %64 : vector<8x128xf32> to vector<1x8x128xf32>
    tpu.vector_store %arg6[%c1_16, %c0_17, %c0_18], %67 {strides = array<i32>} : memref<7x8x128xf32, #tpu.memory_space<vmem>>, vector<1x8x128xf32>,
    %c2_19 = arith.constant 2 : index
    %68 = memref.load %arg3[%c2_19] : memref<21xf32, #tpu.memory_space<smem>>
    %69 = vector.broadcast %68 : f32 to vector<8x128xf32>
    %70 = arith.mulf %9, %69 : vector<8x128xf32>
    %c2_20 = arith.constant 2 : index
    %71 = memref.load %arg4[%c2_20] : memref<7xf32, #tpu.memory_space<smem>>
    %72 = vector.broadcast %71 : f32 to vector<8x128xf32>
    %73 = arith.addf %70, %72 : vector<8x128xf32>
    %c9 = arith.constant 9 : index
    %74 = memref.load %arg3[%c9] : memref<21xf32, #tpu.memory_space<smem>>
    %75 = vector.broadcast %74 : f32 to vector<8x128xf32>
    %76 = arith.mulf %18, %75 : vector<8x128xf32>
    %77 = arith.addf %73, %76 : vector<8x128xf32>
    %c16 = arith.constant 16 : index
    %78 = memref.load %arg3[%c16] : memref<21xf32, #tpu.memory_space<smem>>
    %79 = vector.broadcast %78 : f32 to vector<8x128xf32>
    %80 = arith.mulf %27, %79 : vector<8x128xf32>
    %81 = arith.addf %77, %80 : vector<8x128xf32>
    %cst_21 = arith.constant 0.00999999977 : f32
    %82 = vector.broadcast %cst_21 : f32 to vector<8x128xf32>
    %83 = arith.mulf %82, %81 : vector<8x128xf32>
    %84 = arith.maximumf %81, %83 : vector<8x128xf32>
    %c2_22 = arith.constant 2 : index
    %c0_23 = arith.constant 0 : index
    %c0_24 = arith.constant 0 : index
    %85 = vector.load %arg6[%c2_22, %c0_23, %c0_24] : memref<7x8x128xf32, #tpu.memory_space<vmem>>, vector<1x8x128xf32>
    %86 = vector.shape_cast %85 : vector<1x8x128xf32> to vector<8x128xf32>
    %87 = vector.shape_cast %84 : vector<8x128xf32> to vector<1x8x128xf32>
    tpu.vector_store %arg6[%c2_22, %c0_23, %c0_24], %87 {strides = array<i32>} : memref<7x8x128xf32, #tpu.memory_space<vmem>>, vector<1x8x128xf32>,
    %c3 = arith.constant 3 : index
    %88 = memref.load %arg3[%c3] : memref<21xf32, #tpu.memory_space<smem>>
    %89 = vector.broadcast %88 : f32 to vector<8x128xf32>
    %90 = arith.mulf %9, %89 : vector<8x128xf32>
    %c3_25 = arith.constant 3 : index
    %91 = memref.load %arg4[%c3_25] : memref<7xf32, #tpu.memory_space<smem>>
    %92 = vector.broadcast %91 : f32 to vector<8x128xf32>
    %93 = arith.addf %90, %92 : vector<8x128xf32>
    %c10 = arith.constant 10 : index
    %94 = memref.load %arg3[%c10] : memref<21xf32, #tpu.memory_space<smem>>
    %95 = vector.broadcast %94 : f32 to vector<8x128xf32>
    %96 = arith.mulf %18, %95 : vector<8x128xf32>
    %97 = arith.addf %93, %96 : vector<8x128xf32>
    %c17 = arith.constant 17 : index
    %98 = memref.load %arg3[%c17] : memref<21xf32, #tpu.memory_space<smem>>
    %99 = vector.broadcast %98 : f32 to vector<8x128xf32>
    %100 = arith.mulf %27, %99 : vector<8x128xf32>
    %101 = arith.addf %97, %100 : vector<8x128xf32>
    %cst_26 = arith.constant 0.00999999977 : f32
    %102 = vector.broadcast %cst_26 : f32 to vector<8x128xf32>
    %103 = arith.mulf %102, %101 : vector<8x128xf32>
    %104 = arith.maximumf %101, %103 : vector<8x128xf32>
    %c3_27 = arith.constant 3 : index
    %c0_28 = arith.constant 0 : index
    %c0_29 = arith.constant 0 : index
    %105 = vector.load %arg6[%c3_27, %c0_28, %c0_29] : memref<7x8x128xf32, #tpu.memory_space<vmem>>, vector<1x8x128xf32>
    %106 = vector.shape_cast %105 : vector<1x8x128xf32> to vector<8x128xf32>
    %107 = vector.shape_cast %104 : vector<8x128xf32> to vector<1x8x128xf32>
    tpu.vector_store %arg6[%c3_27, %c0_28, %c0_29], %107 {strides = array<i32>} : memref<7x8x128xf32, #tpu.memory_space<vmem>>, vector<1x8x128xf32>,
    %c4 = arith.constant 4 : index
    %108 = memref.load %arg3[%c4] : memref<21xf32, #tpu.memory_space<smem>>
    %109 = vector.broadcast %108 : f32 to vector<8x128xf32>
    %110 = arith.mulf %9, %109 : vector<8x128xf32>
    %c4_30 = arith.constant 4 : index
    %111 = memref.load %arg4[%c4_30] : memref<7xf32, #tpu.memory_space<smem>>
    %112 = vector.broadcast %111 : f32 to vector<8x128xf32>
    %113 = arith.addf %110, %112 : vector<8x128xf32>
    %c11 = arith.constant 11 : index
    %114 = memref.load %arg3[%c11] : memref<21xf32, #tpu.memory_space<smem>>
    %115 = vector.broadcast %114 : f32 to vector<8x128xf32>
    %116 = arith.mulf %18, %115 : vector<8x128xf32>
    %117 = arith.addf %113, %116 : vector<8x128xf32>
    %c18 = arith.constant 18 : index
    %118 = memref.load %arg3[%c18] : memref<21xf32, #tpu.memory_space<smem>>
    %119 = vector.broadcast %118 : f32 to vector<8x128xf32>
    %120 = arith.mulf %27, %119 : vector<8x128xf32>
    %121 = arith.addf %117, %120 : vector<8x128xf32>
    %cst_31 = arith.constant 0.00999999977 : f32
    %122 = vector.broadcast %cst_31 : f32 to vector<8x128xf32>
    %123 = arith.mulf %122, %121 : vector<8x128xf32>
    %124 = arith.maximumf %121, %123 : vector<8x128xf32>
    %c4_32 = arith.constant 4 : index
    %c0_33 = arith.constant 0 : index
    %c0_34 = arith.constant 0 : index
    %125 = vector.load %arg6[%c4_32, %c0_33, %c0_34] : memref<7x8x128xf32, #tpu.memory_space<vmem>>, vector<1x8x128xf32>
    %126 = vector.shape_cast %125 : vector<1x8x128xf32> to vector<8x128xf32>
    %127 = vector.shape_cast %124 : vector<8x128xf32> to vector<1x8x128xf32>
    tpu.vector_store %arg6[%c4_32, %c0_33, %c0_34], %127 {strides = array<i32>} : memref<7x8x128xf32, #tpu.memory_space<vmem>>, vector<1x8x128xf32>,
    %c5 = arith.constant 5 : index
    %128 = memref.load %arg3[%c5] : memref<21xf32, #tpu.memory_space<smem>>
    %129 = vector.broadcast %128 : f32 to vector<8x128xf32>
    %130 = arith.mulf %9, %129 : vector<8x128xf32>
    %c5_35 = arith.constant 5 : index
    %131 = memref.load %arg4[%c5_35] : memref<7xf32, #tpu.memory_space<smem>>
    %132 = vector.broadcast %131 : f32 to vector<8x128xf32>
    %133 = arith.addf %130, %132 : vector<8x128xf32>
    %c12 = arith.constant 12 : index
    %134 = memref.load %arg3[%c12] : memref<21xf32, #tpu.memory_space<smem>>
    %135 = vector.broadcast %134 : f32 to vector<8x128xf32>
    %136 = arith.mulf %18, %135 : vector<8x128xf32>
    %137 = arith.addf %133, %136 : vector<8x128xf32>
    %c19 = arith.constant 19 : index
    %138 = memref.load %arg3[%c19] : memref<21xf32, #tpu.memory_space<smem>>
    %139 = vector.broadcast %138 : f32 to vector<8x128xf32>
    %140 = arith.mulf %27, %139 : vector<8x128xf32>
    %141 = arith.addf %137, %140 : vector<8x128xf32>
    %cst_36 = arith.constant 0.00999999977 : f32
    %142 = vector.broadcast %cst_36 : f32 to vector<8x128xf32>
    %143 = arith.mulf %142, %141 : vector<8x128xf32>
    %144 = arith.maximumf %141, %143 : vector<8x128xf32>
    %c5_37 = arith.constant 5 : index
    %c0_38 = arith.constant 0 : index
    %c0_39 = arith.constant 0 : index
    %145 = vector.load %arg6[%c5_37, %c0_38, %c0_39] : memref<7x8x128xf32, #tpu.memory_space<vmem>>, vector<1x8x128xf32>
    %146 = vector.shape_cast %145 : vector<1x8x128xf32> to vector<8x128xf32>
    %147 = vector.shape_cast %144 : vector<8x128xf32> to vector<1x8x128xf32>
    tpu.vector_store %arg6[%c5_37, %c0_38, %c0_39], %147 {strides = array<i32>} : memref<7x8x128xf32, #tpu.memory_space<vmem>>, vector<1x8x128xf32>,
    %c6 = arith.constant 6 : index
    %148 = memref.load %arg3[%c6] : memref<21xf32, #tpu.memory_space<smem>>
    %149 = vector.broadcast %148 : f32 to vector<8x128xf32>
    %150 = arith.mulf %9, %149 : vector<8x128xf32>
    %c6_40 = arith.constant 6 : index
    %151 = memref.load %arg4[%c6_40] : memref<7xf32, #tpu.memory_space<smem>>
    %152 = vector.broadcast %151 : f32 to vector<8x128xf32>
    %153 = arith.addf %150, %152 : vector<8x128xf32>
    %c13 = arith.constant 13 : index
    %154 = memref.load %arg3[%c13] : memref<21xf32, #tpu.memory_space<smem>>
    %155 = vector.broadcast %154 : f32 to vector<8x128xf32>
    %156 = arith.mulf %18, %155 : vector<8x128xf32>
    %157 = arith.addf %153, %156 : vector<8x128xf32>
    %c20 = arith.constant 20 : index
    %158 = memref.load %arg3[%c20] : memref<21xf32, #tpu.memory_space<smem>>
    %159 = vector.broadcast %158 : f32 to vector<8x128xf32>
    %160 = arith.mulf %27, %159 : vector<8x128xf32>
    %161 = arith.addf %157, %160 : vector<8x128xf32>
    %cst_41 = arith.constant 0.00999999977 : f32
    %162 = vector.broadcast %cst_41 : f32 to vector<8x128xf32>
    %163 = arith.mulf %162, %161 : vector<8x128xf32>
    %164 = arith.maximumf %161, %163 : vector<8x128xf32>
    %c6_42 = arith.constant 6 : index
    %c0_43 = arith.constant 0 : index
    %c0_44 = arith.constant 0 : index
    %165 = vector.load %arg6[%c6_42, %c0_43, %c0_44] : memref<7x8x128xf32, #tpu.memory_space<vmem>>, vector<1x8x128xf32>
    %166 = vector.shape_cast %165 : vector<1x8x128xf32> to vector<8x128xf32>
    %167 = vector.shape_cast %164 : vector<8x128xf32> to vector<1x8x128xf32>
    tpu.vector_store %arg6[%c6_42, %c0_43, %c0_44], %167 {strides = array<i32>} : memref<7x8x128xf32, #tpu.memory_space<vmem>>, vector<1x8x128xf32>,
    return
  }
  func.func @transform_0(%arg0: i32) -> i32 {
    %c0_i32 = arith.constant 0 : i32
    %c0_i32_0 = arith.constant 0 : i32
    return %c0_i32 : i32
  }
  func.func @transform_1(%arg0: i32) -> i32 {
    %c0_i32 = arith.constant 0 : i32
    %c0_i32_0 = arith.constant 0 : i32
    return %c0_i32 : i32
  }
  func.func @transform_2(%arg0: i32) -> i32 {
    %c0_i32 = arith.constant 0 : i32
    %c0_i32_0 = arith.constant 0 : i32
    return %c0_i32 : i32
  }
  func.func @transform_3(%arg0: i32) -> i32 {
    %c0_i32 = arith.constant 0 : i32
    %c0_i32_0 = arith.constant 0 : i32
    return %c0_i32 : i32
  }
  func.func @transform_4(%arg0: i32) -> (i32, i32) {
    %c0_i32 = arith.constant 0 : i32
    %c0_i32_0 = arith.constant 0 : i32
    return %arg0, %c0_i32 : i32, i32
  }
  func.func @transform_5(%arg0: i32) -> (i32, i32, i32) {
    %c0_i32 = arith.constant 0 : i32
    %c0_i32_0 = arith.constant 0 : i32
    %c0_i32_1 = arith.constant 0 : i32
    return %c0_i32, %arg0, %c0_i32_0 : i32, i32, i32
  }
}

</mosaic_0001>

<bundles_post_ra>
// kernel: tpu_custom_call.1
= control target key start
LH: loop header
LB: loop body
LE: loop exit
PB: predicated region body
PF: predicated region fallthrough
CT: control target
= control target key end

     0   :  { %10 = vsyncpa [#allocation4], 0  ;;  %s533_s0 = inlined_call_operand.hbm [shape: f32[3], index: 0, kind: input, shape index: {}]   ;;  %s534_s1 = inlined_call_operand.vmem [shape: f32[3], index: 1, kind: input, shape index: {}]   ;;  %s535_s2 = inlined_call_operand.vmem [shape: f32[21], index: 2, kind: input, shape index: {}]   ;;  %s536_s3 = inlined_call_operand.vmem [shape: f32[7], index: 3, kind: input, shape index: {}]   ;;  %s537_s4 = inlined_call_operand.vmem [shape: f32[8,128], index: 4, kind: input, shape index: {}]   ;;  %s538_s5 = inlined_call_operand.hbm [shape: f32[7,8,128], index: 5, kind: output, shape index: {}]  }
   0x1   :  { %11 = vsyncpa [#allocation5], 0 }
   0x2   :  { %12 = vsyncpa [#allocation8], 0  ;;  %s38_s20 = sshll.u32 %s535_s2, 4  ;;  %s39_s20 = int_to_ptr.vmem [resolvable:$true] %s38_s20 }
   0x3   :  { %13 = vsyncpa [#allocation3], 0  ;;  %s273_s21 = scalar_lea.vmem %s39_s20, 16  ;;  %p278_p1 = scmp.lt.s32.totalorder %s39_s20, %s39_s20 }
   0x4   :  { %p274_p0 = scmp.ne.s32.totalorder %s39_s20, %s273_s21  ;;  %p279_p2 = scmp.lt.s32.totalorder %s273_s21, %s273_s21 }
   0x6   :  { %p280_p3 = por %p279_p2, %p278_p1 }
   0x8   :  { %p281_p4 = pnand %p280_p3, %p274_p0 }
   0xa   :  { %284 = shalt.err (!%p281_p4)
}
   0xb   :  { %s349_s22 = smov [#allocation7]   ;;  %s285_s25 = scalar_lea.hbm %s533_s0, 16 }
   0xc   :  { %41 = dma.vmem_to_smem %s39_s20, 16, %s349_s22, [#allocation8]  }
   0xd   :  { %p286_p5 = scmp.ne.s32.totalorder %s533_s0, %s285_s25  ;;  %p289_p6 = scmp.lt.u32.totalorder %s285_s25, %s533_s0 }
   0xf   :  { %p291_p7 = pnand %p289_p6, %p286_p5 }
  0x11   :  { %294 = shalt.err (!%p291_p7)
}
  0x12   :  { %s350_s29 = smov [#allocation2]   ;;  %s28_s9 = sshll.u32 %s534_s1, 4  ;;  %s29_s9 = int_to_ptr.vmem [resolvable:$true] %s28_s9 }
  0x13   :  { %21 = dma.hbm_to_smem %s533_s0, 16, %s350_s29, [#allocation4]  }
  0x14   :  { %s48_s12 = sshll.u32 %s536_s3, 4  ;;  %s295_s13 = scalar_lea.vmem %s29_s9, 16  ;;  %s49_s12 = int_to_ptr.vmem [resolvable:$true] %s48_s12 }
  0x15   :  { %p296_p8 = scmp.ne.s32.totalorder %s29_s9, %s295_s13  ;;  %p300_p9 = scmp.lt.s32.totalorder %s29_s9, %s29_s9 }
  0x16   :  { %p301_p10 = scmp.lt.s32.totalorder %s295_s13, %s295_s13 }
  0x18   :  { %p302_p11 = por %p301_p10, %p300_p9 }
  0x1a   :  { %p303_p12 = pnand %p302_p11, %p296_p8 }
  0x1c   :  { %306 = shalt.err (!%p303_p12)
}
  0x1d   :  { %s351_s14 = smov [#allocation6]   ;;  %s307_s0 = scalar_lea.vmem %s49_s12, 16 }
  0x1e   :  { %31 = dma.vmem_to_smem %s29_s9, 16, %s351_s14, [#allocation5]  }
  0x1f   :  { %p308_p13 = scmp.ne.s32.totalorder %s49_s12, %s307_s0  ;;  %p312_p0 = scmp.lt.s32.totalorder %s49_s12, %s49_s12 }
  0x20   :  { %p313_p1 = scmp.lt.s32.totalorder %s307_s0, %s307_s0 }
  0x22   :  { %p314_p2 = por %p313_p1, %p312_p0 }
  0x24   :  { %p315_p3 = pnand %p314_p2, %p308_p13 }
  0x26   :  { %318 = shalt.err (!%p315_p3)
}
  0x27   :  { %s352_s1 = smov [#allocation9]  }
  0x28   :  { %51 = dma.vmem_to_smem %s49_s12, 16, %s352_s1, [#allocation8]  }
  0x29   :  { %341 = dma.done.wait [#allocation4], 16  }
  0x2a   :  { %342 = vsyncadd [#allocation4], 4294967280 }
  0x2b   :  { %343 = dma.done.wait [#allocation5], 16  }
  0x2c   :  { %344 = vsyncadd [#allocation5], 4294967280 }
  0x2d   :  { %345 = dma.done.wait [#allocation8], 32  }
  0x2e   :  { %346 = vsyncadd [#allocation8], 4294967264 }
  0x2f   :  { %66 = sfence }
  0x30   :  { %s68_s3 = sld [smem:[#allocation2]]  ;;  %s236_s16 = sld [smem:[#allocation2 + $0x1]]  ;;  %v67_v0 = vld [vmem:[%s537_s4] sm:$0xff] }
  0x31   :  { %s71_s15 = sld [smem:[#allocation6]]  ;;  %s237_s17 = sld [smem:[#allocation6 + $0x1]] }
  0x32   :  { %s238_s18 = sld [smem:[#allocation2 + $0x2]]  ;;  %s407_s20 = sld [smem:[#allocation7]] }
  0x33   :  { %s239_s19 = sld [smem:[#allocation6 + $0x2]]  ;;  %s409_s21 = sld [smem:[#allocation9]] }
  0x34   :  { %s414_s24 = sld [smem:[#allocation7 + $0x7]]  ;;  %s416_s25 = sld [smem:[#allocation7 + $0xe]] }
  0x35   :  { %s418_s26 = sld [smem:[#allocation7 + $0x1]]  ;;  %s422_s2 = sld [smem:[#allocation7 + $0x8]] }
  0x36   :  { %s420_s27 = sld [smem:[#allocation9 + $0x1]]  ;;  %v69_v1 = vstv %s68_s3  ;;  %s424_s28 = sld [smem:[#allocation7 + $0xf]]  ;;  %v77_v4 = vstv %s236_s16 }
  0x37   :  { %v72_v2 = vstv %s71_s15  ;;  %v70_v3 = vmul.f32 %v69_v1, %v67_v0  ;;  %v80_v5 = vstv %s237_s17  ;;  %s426_s4 = sld [smem:[#allocation7 + $0x2]]  ;;  %v78_v6 = vmul.f32 %v77_v4, %v67_v0  ;;  %s430_s30 = sld [smem:[#allocation7 + $0x9]] }
  0x38   :  { %s428_s29 = sld [smem:[#allocation9 + $0x2]]  ;;  %v85_v7 = vstv %s238_s18  ;;  %s432_s6 = sld [smem:[#allocation7 + $0x10]]  ;;  %v93_v12 = vstv %s407_s20 }
  0x39   :  { %v88_v8 = vstv %s239_s19  ;;  %v73_v9 = vadd.f32 %v72_v2, %v70_v3  ;;  %v86_v10 = vmul.f32 %v85_v7, %v67_v0  ;;  %s434_s7 = sld [smem:[#allocation7 + $0x3]]  ;;  %v81_v11 = vadd.f32 %v80_v5, %v78_v6  ;;  %s442_s9 = sld [smem:[#allocation7 + $0xa]] }
  0x3a   :  { %v96_v13 = vstv %s409_s21  ;;  %s438_s8 = sld [smem:[#allocation9 + $0x3]]  ;;  %v99_v16 = vstv %s414_s24  ;;  %v103_v17 = vstv %s416_s25  ;;  %s444_s10 = sld [smem:[#allocation7 + $0x11]] }
  0x3b   :  { %v74_v14 = vmul.f32 0.01, %v73_v9  ;;  %v89_v15 = vadd.f32 %v88_v8, %v86_v10  ;;  %v82_v18 = vmul.f32 0.01, %v81_v11  ;;  %v110_v19 = vstv %s418_s26  ;;  %s453_s11 = sld [smem:[#allocation7 + $0x4]]  ;;  %s462_s13 = sld [smem:[#allocation7 + $0xb]] }
  0x3c   :  { %v113_v20 = vstv %s420_s27  ;;  %v116_v21 = vstv %s422_s2  ;;  %v120_v24 = vstv %s424_s28  ;;  %s455_s12 = sld [smem:[#allocation9 + $0x4]]  ;;  %s469_s14 = sld [smem:[#allocation7 + $0x12]] }
  0x3d   :  { %v449_v22 = vmax.f32 %v73_v9, %v74_v14  ;;  %v90_v23 = vmul.f32 0.01, %v89_v15  ;;  %v128_v25 = vstv %s426_s4  ;;  %v457_v26 = vmax.f32 %v81_v11, %v82_v18  ;;  %s477_s0 = sld [smem:[#allocation7 + $0x5]]  ;;  %s484_s3 = sld [smem:[#allocation7 + $0xc]] }
  0x3e   :  { %v131_v27 = vstv %s428_s29  ;;  %v134_v28 = vstv %s430_s30  ;;  %v138_v29 = vstv %s432_s6  ;;  %s479_s1 = sld [smem:[#allocation9 + $0x5]]  ;;  %s486_s15 = sld [smem:[#allocation7 + $0x13]] }
  0x3f   :  { %v464_v30 = vmax.f32 %v89_v15, %v90_v23  ;;  %v94_v31 = vmul.f32 %v93_v12, %v449_v22  ;;  %v111_v32 = vmul.f32 %v110_v19, %v449_v22  ;;  %v129_v33 = vmul.f32 %v128_v25, %v449_v22  ;;  %s490_s16 = sld [smem:[#allocation7 + $0x6]]  ;;  %s498_s18 = sld [smem:[#allocation7 + $0xd]] }
  0x40   :  { %v100_v34 = vmul.f32 %v99_v16, %v457_v26  ;;  %v117_v35 = vmul.f32 %v116_v21, %v457_v26  ;;  %v135_v36 = vmul.f32 %v134_v28, %v457_v26  ;;  %v146_v37 = vstv %s434_s7  ;;  %s492_s17 = sld [smem:[#allocation9 + $0x6]]  ;;  %s500_s19 = sld [smem:[#allocation7 + $0x14]] }
  0x41   :  { %v97_v38 = vadd.f32 %v96_v13, %v94_v31  ;;  %v104_v39 = vmul.f32 %v103_v17, %v464_v30  ;;  %v114_v40 = vadd.f32 %v113_v20, %v111_v32  ;;  %v121_v41 = vmul.f32 %v120_v24, %v464_v30  ;;  %s353_s20 = smov [#allocation10]  }
  0x42   :  { %v132_v42 = vadd.f32 %v131_v27, %v129_v33  ;;  %v139_v43 = vmul.f32 %v138_v29, %v464_v30  ;;  %v147_v44 = vmul.f32 %v146_v37, %v449_v22  ;;  %v149_v45 = vstv %s438_s8  ;;  %s222_s21 = sshll.u32 %s353_s20, 4  ;;  %s223_s21 = int_to_ptr.vmem [resolvable:$true] %s222_s21 }
  0x43   :  { %v101_v46 = vadd.f32 %v100_v34, %v97_v38  ;;  %v118_v47 = vadd.f32 %v117_v35, %v114_v40  ;;  %v152_v48 = vstv %s442_s9  ;;  %v156_v49 = vstv %s444_s10  ;;  %s319_s22 = scalar_lea.vmem %s223_s21, 896  ;;  %p324_p5 = scmp.lt.s32.totalorder %s223_s21, %s223_s21 }
  0x44   :  { %v136_v50 = vadd.f32 %v135_v36, %v132_v42  ;;  %v150_v51 = vadd.f32 %v149_v45, %v147_v44  ;;  %v153_v52 = vmul.f32 %v152_v48, %v457_v26  ;;  %v157_v53 = vmul.f32 %v156_v49, %v464_v30  ;;  %p320_p4 = scmp.ne.s32.totalorder %s223_s21, %s319_s22  ;;  %p325_p6 = scmp.lt.s32.totalorder %s319_s22, %s319_s22 }
  0x45   :  { %v105_v54 = vadd.f32 %v104_v39, %v101_v46  ;;  %v122_v55 = vadd.f32 %v121_v41, %v118_v47  ;;  %v164_v56 = vstv %s453_s11  ;;  %v167_v57 = vstv %s455_s12 }
  0x46   :  { %v140_v58 = vadd.f32 %v139_v43, %v136_v50  ;;  %v154_v59 = vadd.f32 %v153_v52, %v150_v51  ;;  %v165_v60 = vmul.f32 %v164_v56, %v449_v22  ;;  %v170_v61 = vstv %s462_s13  ;;  %p326_p7 = por %p325_p6, %p324_p5 }
  0x47   :  { %v106_v62 = vmul.f32 0.01, %v105_v54  ;;  %v123_v63 = vmul.f32 0.01, %v122_v55  ;;  %v171_v0 = vmul.f32 %v170_v61, %v457_v26  ;;  %v174_v1 = vstv %s469_s14 }
  0x48   :  { %v141_v2 = vmul.f32 0.01, %v140_v58  ;;  %v158_v3 = vadd.f32 %v157_v53, %v154_v59  ;;  %v168_v4 = vadd.f32 %v167_v57, %v165_v60  ;;  %v175_v5 = vmul.f32 %v174_v1, %v464_v30  ;;  %p327_p8 = pnand %p326_p7, %p320_p4 }
  0x49   :  { %v107_v6 = vmax.f32 %v105_v54, %v106_v62  ;;  %v124_v7 = vmax.f32 %v122_v55, %v123_v63  ;;  %v182_v8 = vstv %s477_s0  ;;  %v185_v9 = vstv %s479_s1 }
  0x4a   :  { %v142_v10 = vmax.f32 %v140_v58, %v141_v2  ;;  %v159_v11 = vmul.f32 0.01, %v158_v3  ;;  %v172_v12 = vadd.f32 %v171_v0, %v168_v4  ;;  %v183_v13 = vmul.f32 %v182_v8, %v449_v22 }
  0x4b   :  { %108 = vst [vmem:[#allocation10] sm:$0xff] %v107_v6  ;;  %126 = vst [vmem:[#allocation10 + $0x8] sm:$0xff] %v124_v7  ;;  %v188_v14 = vstv %s484_s3  ;;  %v192_v15 = vstv %s486_s15  ;;  %v200_v16 = vstv %s490_s16  ;;  %v203_v17 = vstv %s492_s17 }
  0x4c   :  { %144 = vst [vmem:[#allocation10 + $0x10] sm:$0xff] %v142_v10  ;;  %v160_v18 = vmax.f32 %v158_v3, %v159_v11  ;;  %v176_v19 = vadd.f32 %v175_v5, %v172_v12  ;;  %v186_v20 = vadd.f32 %v185_v9, %v183_v13  ;;  %v189_v21 = vmul.f32 %v188_v14, %v457_v26 }
  0x4d   :  { %v193_v23 = vmul.f32 %v192_v15, %v464_v30  ;;  %v201_v24 = vmul.f32 %v200_v16, %v449_v22  ;;  %v206_v25 = vstv %s498_s18  ;;  %v210_v27 = vstv %s500_s19 }
  0x4e   :  { %162 = vst [vmem:[#allocation10 + $0x18] sm:$0xff] %v160_v18  ;;  %v177_v28 = vmul.f32 0.01, %v176_v19  ;;  %v190_v29 = vadd.f32 %v189_v21, %v186_v20  ;;  %v207_v31 = vmul.f32 %v206_v25, %v457_v26  ;;  %v211_v33 = vmul.f32 %v210_v27, %v464_v30 }
  0x4f   :  { %v204_v32 = vadd.f32 %v203_v17, %v201_v24 }
  0x50   :  { %v178_v34 = vmax.f32 %v176_v19, %v177_v28  ;;  %v194_v35 = vadd.f32 %v193_v23, %v190_v29 }
  0x51   :  { %v208_v36 = vadd.f32 %v207_v31, %v204_v32 }
  0x52   :  { %180 = vst [vmem:[#allocation10 + $0x20] sm:$0xff] %v178_v34  ;;  %v195_v37 = vmul.f32 0.01, %v194_v35 }
  0x53   :  { %v212_v38 = vadd.f32 %v211_v33, %v208_v36 }
  0x54   :  { %v196_v39 = vmax.f32 %v194_v35, %v195_v37 }
  0x55   :  { %v213_v22 = vmul.f32 0.01, %v212_v38 }
  0x56   :  { %198 = vst [vmem:[#allocation10 + $0x28] sm:$0xff] %v196_v39 }
  0x57   :  { %v214_v40 = vmax.f32 %v212_v38, %v213_v22 }
  0x59   :  { %216 = vst [vmem:[#allocation10 + $0x30] sm:$0xff] %v214_v40 }
  0x5a   :  { %330 = shalt.err (!%p327_p8)
}
  0x5b   :  { %s331_s25 = scalar_lea.hbm %s538_s5, 896 }
  0x5c   :  { %p332_p9 = scmp.ne.s32.totalorder %s538_s5, %s331_s25  ;;  %p335_p10 = scmp.lt.u32.totalorder %s331_s25, %s538_s5 }
  0x5e   :  { %p337_p11 = pnand %p335_p10, %p332_p9 }
  0x60   :  { %340 = shalt.err (!%p337_p11)
}
  0x61   :  { %s354_s4 = smov 128   ;;  %s355_s29 = smov 8  }
  0x62   :  { %228 = dma.vmem_to_hbm [thread:$0]  %s223_s21, 896, %s538_s5, [#allocation3], %s354_s4, %s354_s4, %s355_s29  }
  0x63   :  { %347 = dma.done.wait [#allocation3], 896  }
  0x64   :  { %348 = vsyncadd [#allocation3], 4294966400 }
  0x65   :  { %232 = vsyncpa [#allocation3], 1 }
  0x66   :  { %233 = vsyncpa [#allocation4], 1 }
  0x67   :  { %234 = vsyncpa [#allocation5], 1 }
  0x68   :  { %235 = vsyncpa [#allocation8], 1 }

</bundles_post_ra>
